<compile_context>
chip_gen: v5e
topology: v5e:2x2
jax: 0.10.0
libtpu: 0.0.40
codegen_flags: <defaults>
</compile_context>

<pallas_src>
import functools
import math

import jax
import jax.numpy as jnp
from jax.experimental import pallas as pl
from jax.experimental.pallas import tpu as pltpu


def _round_up(v, m):
    return (v + m - 1) // m * m


def _pad2(a, rows, cols):
    return jnp.pad(a, ((0, rows - a.shape[0]), (0, cols - a.shape[1])))


def _gin_layer_kernel(a_ref, x_ref, w1_ref, b1_ref, w2_ref, b2_ref, o_ref,
                      acc_ref, *, final_relu, resident_x, tk):
    k = pl.program_id(1)

    @pl.when(k == 0)
    def _init():
        acc_ref[...] = jnp.zeros_like(acc_ref)

    if resident_x:
        # x kept resident in VMEM for the whole layer; slice the k-chunk here.
        start = pl.multiple_of(k * tk, 128)
        xk = x_ref[pl.ds(start, tk), :]
    else:
        xk = x_ref[...]

    # (A + I) @ x accumulated over k tiles.  Adjacency tile arrives as int8
    # (exact small multiplicities); upcast to bf16 so the MXU runs the
    # bf16 x bf16 path at native rate with f32 accumulation.
    acc_ref[...] += jnp.dot(a_ref[...].astype(jnp.bfloat16), xk,
                            preferred_element_type=jnp.float32)

    @pl.when(k == pl.num_programs(1) - 1)
    def _epilogue():
        # MLP + bias (+ trailing ReLU) once per row tile, in f32.
        h = acc_ref[...]
        h = jnp.dot(h, w1_ref[...], preferred_element_type=jnp.float32) + b1_ref[...]
        h = jnp.maximum(h, 0.0)
        h = jnp.dot(h, w2_ref[...], preferred_element_type=jnp.float32) + b2_ref[...]
        if final_relu:
            h = jnp.maximum(h, 0.0)
        o_ref[...] = h.astype(o_ref.dtype)


def _vmem_limit_bytes(tm, tk, n_pad, f_in, f_out, resident_x):
    adj = tm * tk * 1 * 2                         # int8 tile, double-buffered
    if resident_x:
        xb = n_pad * f_in * 2 * 2                 # bf16, allow 2 buffers
    else:
        xb = tk * f_in * 2 * 2
    wts = ((f_in * f_in + f_in * f_out) * 4 + (f_in + f_out) * 4) * 2
    acc = tm * f_in * 4
    out = tm * f_out * 4 * 2
    need = adj + xb + wts + acc + out
    # ~50% margin + fixed slack; keep inside v7x's 64 MiB physical per TC.
    return int(min(max(int(need * 1.5) + (4 << 20), 16 << 20), 56 << 20))


def gin_layer(adj, x, w1, b1, w2, b2, *, final_relu, tm, tk, out_dtype):
    """One GINConv layer (+ optional trailing ReLU), tiled over (rows, k).

    adj: [Np, Np] int8, adj[dst, src] = edge multiplicity, + identity folded in
    x:   [Np, Fin_p] bf16 (features zero-padded to a multiple of 128 lanes)
    w1:  [Fin_p, Fin_p]  b1: [1, Fin_p]   (f32)
    w2:  [Fin_p, Fout_p] b2: [1, Fout_p]  (f32)
    """
    n_pad, f_in = x.shape
    f_out = w2.shape[1]
    grid = (n_pad // tm, n_pad // tk)

    # Keep x fully resident in VMEM when it is cheap to do so (no re-stream).
    resident_x = (n_pad * f_in * 2) <= (8 << 20)
    if resident_x:
        x_spec = pl.BlockSpec((n_pad, f_in), lambda i, k: (0, 0))
    else:
        x_spec = pl.BlockSpec((tk, f_in), lambda i, k: (k, 0))

    kernel = functools.partial(_gin_layer_kernel, final_relu=final_relu,
                               resident_x=resident_x, tk=tk)
    return pl.pallas_call(
        kernel,
        out_shape=jax.ShapeDtypeStruct((n_pad, f_out), out_dtype),
        grid_spec=pltpu.PrefetchScalarGridSpec(
            num_scalar_prefetch=0,
            grid=grid,
            in_specs=[
                pl.BlockSpec((tm, tk), lambda i, k: (i, k)),       # adjacency tile (int8)
                x_spec,                                            # x (resident or k-tile)
                pl.BlockSpec((f_in, f_in), lambda i, k: (0, 0)),   # w1 (full)
                pl.BlockSpec((1, f_in), lambda i, k: (0, 0)),      # b1
                pl.BlockSpec((f_in, f_out), lambda i, k: (0, 0)),  # w2 (full)
                pl.BlockSpec((1, f_out), lambda i, k: (0, 0)),     # b2
            ],
            out_specs=pl.BlockSpec((tm, f_out), lambda i, k: (i, 0)),
            scratch_shapes=[pltpu.VMEM((tm, f_in), jnp.float32)],
        ),
        compiler_params=pltpu.CompilerParams(
            # Row axis split across TensorCores (v7x megacore); k is a reduction.
            dimension_semantics=("parallel", "arbitrary"),
            vmem_limit_bytes=_vmem_limit_bytes(tm, tk, n_pad, f_in, f_out,
                                               resident_x),
        ),
    )(adj, x, w1, b1, w2, b2)


def init_linear(key, fan_in, fan_out):
    """PyTorch-style nn.Linear init: U(-1/sqrt(fan_in), 1/sqrt(fan_in))."""
    kw, kb = jax.random.split(key)
    bound = 1.0 / math.sqrt(fan_in)
    # stored transposed vs torch: shape (in, out) so the kernel does x @ W
    w = jax.random.uniform(kw, (fan_in, fan_out), jnp.float32, -bound, bound)
    b = jax.random.uniform(kb, (1, fan_out), jnp.float32, -bound, bound)
    return w, b


def build_params(key, c_in, c_hidden, c_out, num_layers=2):
    """Mirror GNNModel.__init__ layer shapes (non-Transformer branch)."""
    del c_out  # reference code never rebinds out_channels to c_out
    params = []
    in_ch, out_ch = c_in, c_hidden
    for _ in range(num_layers - 1):
        key, k1, k2 = jax.random.split(key, 3)
        w1, b1 = init_linear(k1, in_ch, in_ch)
        w2, b2 = init_linear(k2, in_ch, out_ch)
        params.append((w1, b1, w2, b2, True))   # followed by ReLU (+ Dropout=id)
        in_ch = c_hidden
    key, k1, k2 = jax.random.split(key, 3)
    w1, b1 = init_linear(k1, in_ch, in_ch)
    w2, b2 = init_linear(k2, in_ch, out_ch)
    params.append((w1, b1, w2, b2, False))      # final layer: no trailing ReLU
    return params


def _pick_tiles(n, tm, tk):
    """Padding-friendly tile selection: tm | n_pad, tk | n_pad, both %128==0."""
    n128 = _round_up(n, 128)
    tm = min(tm, n128)
    # keep >=2 row tiles when the graph allows, so both v7x TCs get work
    if n128 >= 256:
        tm = min(tm, (n128 // 2) // 128 * 128)
    tm = max(128, tm // 128 * 128)
    n_pad = _round_up(n, tm)                    # multiple of tm (and of 128)
    tk = min(tk, n_pad)
    tk = max(128, tk // 128 * 128)
    while n_pad % tk != 0:                      # largest 128-multiple divisor
        tk -= 128
    return tm, tk, n_pad


def gnn_model_forward(x, edge_index, params, *, tm=512, tk=2048):
    """Full GNNModel forward (eval mode).  x: [N, c_in], edge_index: [2, E]."""
    n, c_in = x.shape
    tm, tk, n_pad = _pick_tiles(n, tm, tk)

    src, dst = edge_index[0], edge_index[1]
    # Dense adjacency (adj[dst, src] = #edges src->dst) with the self-loop
    # identity folded in: (A+I)@h = A@h + h  ==  GIN combine with eps=0.
    # Entries are exact small integers -> int8 stream (upcast in-kernel).
    adj = jnp.zeros((n_pad, n_pad), jnp.float32).at[dst, src].add(1.0)
    adj = adj + jnp.eye(n_pad, dtype=jnp.float32)
    adj = adj.astype(jnp.int8)   # exact for multiplicities <= 127

    # Lane-dense layout: pad features to a multiple of 128; carry h in bf16.
    h = _pad2(x, n_pad, _round_up(c_in, 128)).astype(jnp.bfloat16)

    out_width = None
    n_layers = len(params)
    for li, (w1, b1, w2, b2, relu_after) in enumerate(params):
        f_in = w1.shape[0]
        f_out = w2.shape[1]
        f_in_p = _round_up(f_in, 128)
        f_out_p = _round_up(f_out, 128)
        w1p = _pad2(w1, f_in_p, f_in_p)
        b1p = _pad2(b1, 1, f_in_p)
        w2p = _pad2(w2, f_in_p, f_out_p)
        b2p = _pad2(b2, 1, f_out_p)
        is_last = li == n_layers - 1
        # intermediates re-streamed next layer -> bf16; final output -> f32
        out_dtype = jnp.float32 if is_last else jnp.bfloat16
        h = gin_layer(adj, h, w1p, b1p, w2p, b2p,
                      final_relu=relu_after, tm=tm, tk=tk, out_dtype=out_dtype)
        out_width = f_out
    return h[:n, :out_width].astype(jnp.float32)


if __name__ == "__main__":
    c_in, c_hidden, c_out = 4, 32, 3
    num_nodes, num_edges = 8, 16

    key = jax.random.PRNGKey(0)
    kx, ke, kp = jax.random.split(key, 3)

    x = jax.random.normal(kx, (num_nodes, c_in), jnp.float32)
    edge_index = jax.random.randint(ke, (2, num_edges), 0, num_nodes,
                                    dtype=jnp.int32)
    params = build_params(kp, c_in, c_hidden, c_out, num_layers=2)

    out = gnn_model_forward(x, edge_index, params)
    out = jax.block_until_ready(out)
    assert out.shape == (num_nodes, c_hidden), out.shape
    assert bool(jnp.all(jnp.isfinite(out)))
    print("KERNEL_OK")
</pallas_src>

<mosaic_0001>
module attributes {stable_mosaic.version = 11 : i64} {
  func.func @_gin_layer_kernel(%arg0: i32, %arg1: i32, %arg2: memref<128x128xi8, #tpu.memory_space<vmem>>, %arg3: memref<128x128xbf16, #tpu.memory_space<vmem>>, %arg4: memref<128x128xf32, #tpu.memory_space<vmem>>, %arg5: memref<1x128xf32, #tpu.memory_space<vmem>>, %arg6: memref<128x128xf32, #tpu.memory_space<vmem>>, %arg7: memref<1x128xf32, #tpu.memory_space<vmem>>, %arg8: memref<128x128xbf16, #tpu.memory_space<vmem>>, %arg9: memref<128x128xf32, #tpu.memory_space<vmem>>) attributes {dimension_semantics = [#tpu.dimension_semantics<parallel>, #tpu.dimension_semantics<arbitrary>], iteration_bounds = array<i64: 1, 1>, scalar_prefetch = 0 : i64, scratch_operands = 1 : i64, tpu.core_type = #tpu.core_type<tc>, window_params = [{transform_indices = @transform_0, window_bounds = array<i64: 128, 128>}, {pipeline_mode = #tpu.pipeline_mode<synchronous>, transform_indices = @transform_1, window_bounds = array<i64: 128, 128>}, {pipeline_mode = #tpu.pipeline_mode<synchronous>, transform_indices = @transform_2, window_bounds = array<i64: 128, 128>}, {pipeline_mode = #tpu.pipeline_mode<synchronous>, transform_indices = @transform_3, window_bounds = array<i64: 1, 128>}, {pipeline_mode = #tpu.pipeline_mode<synchronous>, transform_indices = @transform_4, window_bounds = array<i64: 128, 128>}, {pipeline_mode = #tpu.pipeline_mode<synchronous>, transform_indices = @transform_5, window_bounds = array<i64: 1, 128>}, {transform_indices = @transform_6, window_bounds = array<i64: 128, 128>}]} {
    %c0_i32 = arith.constant 0 : i32
    %0 = arith.cmpi eq, %arg1, %c0_i32 : i32
    %1 = arith.extui %0 : i1 to i32
    %c0_i32_0 = arith.constant 0 : i32
    %2 = arith.cmpi ne, %1, %c0_i32_0 : i32
    scf.if %2 {
      %cst_9 = arith.constant 0.000000e+00 : f32
      %16 = vector.broadcast %cst_9 : f32 to vector<128x128xf32>
      %c0_10 = arith.constant 0 : index
      %c0_11 = arith.constant 0 : index
      %17 = vector.load %arg9[%c0_10, %c0_11] : memref<128x128xf32, #tpu.memory_space<vmem>>, vector<128x128xf32>
      tpu.vector_store %arg9[%c0_10, %c0_11], %16 {strides = array<i32>} : memref<128x128xf32, #tpu.memory_space<vmem>>, vector<128x128xf32>,
    } else {
    }
    %c128_i32 = arith.constant 128 : i32
    %3 = arith.muli %arg1, %c128_i32 : i32
    %4 = tpu.assume_multiple %3, 128 : i32
    %5 = arith.index_cast %4 : i32 to index
    %c0 = arith.constant 0 : index
    %6 = vector.load %arg3[%5, %c0] : memref<128x128xbf16, #tpu.memory_space<vmem>>, vector<128x128xbf16>
    %c0_1 = arith.constant 0 : index
    %c0_2 = arith.constant 0 : index
    %7 = vector.load %arg9[%c0_1, %c0_2] : memref<128x128xf32, #tpu.memory_space<vmem>>, vector<128x128xf32>
    %c0_3 = arith.constant 0 : index
    %c0_4 = arith.constant 0 : index
    %8 = vector.load %arg2[%c0_3, %c0_4] : memref<128x128xi8, #tpu.memory_space<vmem>>, vector<128x128xi8>
    %9 = arith.sitofp %8 : vector<128x128xi8> to vector<128x128xbf16>
    %cst = arith.constant dense<0.000000e+00> : vector<128x128xf32>
    %10 = tpu.matmul %9, %6, %cst {dimension_numbers = #tpu.dot_dimension_numbers<[1], [0], [0], [1], [0, 0, 1, 1], [], []>} : vector<128x128xbf16>, vector<128x128xbf16>, vector<128x128xf32> -> vector<128x128xf32>
    %11 = arith.addf %7, %10 : vector<128x128xf32>
    %c0_5 = arith.constant 0 : index
    %c0_6 = arith.constant 0 : index
    %12 = vector.load %arg9[%c0_5, %c0_6] : memref<128x128xf32, #tpu.memory_space<vmem>>, vector<128x128xf32>
    tpu.vector_store %arg9[%c0_5, %c0_6], %11 {strides = array<i32>} : memref<128x128xf32, #tpu.memory_space<vmem>>, vector<128x128xf32>,
    %c0_i32_7 = arith.constant 0 : i32
    %13 = arith.cmpi eq, %arg1, %c0_i32_7 : i32
    %14 = arith.extui %13 : i1 to i32
    %c0_i32_8 = arith.constant 0 : i32
    %15 = arith.cmpi ne, %14, %c0_i32_8 : i32
    scf.if %15 {
      %c0_9 = arith.constant 0 : index
      %c0_10 = arith.constant 0 : index
      %16 = vector.load %arg9[%c0_9, %c0_10] : memref<128x128xf32, #tpu.memory_space<vmem>>, vector<128x128xf32>
      %c0_11 = arith.constant 0 : index
      %c0_12 = arith.constant 0 : index
      %17 = vector.load %arg4[%c0_11, %c0_12] : memref<128x128xf32, #tpu.memory_space<vmem>>, vector<128x128xf32>
      %cst_13 = arith.constant dense<0.000000e+00> : vector<128x128xf32>
      %18 = tpu.matmul %16, %17, %cst_13 {dimension_numbers = #tpu.dot_dimension_numbers<[1], [0], [0], [1], [0, 0, 1, 1], [], []>} : vector<128x128xf32>, vector<128x128xf32>, vector<128x128xf32> -> vector<128x128xf32>
      %c0_14 = arith.constant 0 : index
      %c0_15 = arith.constant 0 : index
      %19 = vector.load %arg5[%c0_14, %c0_15] : memref<1x128xf32, #tpu.memory_space<vmem>>, vector<1x128xf32>
      %20 = vector.broadcast %19 : vector<1x128xf32> to vector<128x128xf32>
      %21 = arith.addf %18, %20 : vector<128x128xf32>
      %cst_16 = arith.constant 0.000000e+00 : f32
      %22 = vector.broadcast %cst_16 : f32 to vector<128x128xf32>
      %23 = arith.maximumf %21, %22 : vector<128x128xf32>
      %c0_17 = arith.constant 0 : index
      %c0_18 = arith.constant 0 : index
      %24 = vector.load %arg6[%c0_17, %c0_18] : memref<128x128xf32, #tpu.memory_space<vmem>>, vector<128x128xf32>
      %cst_19 = arith.constant dense<0.000000e+00> : vector<128x128xf32>
      %25 = tpu.matmul %23, %24, %cst_19 {dimension_numbers = #tpu.dot_dimension_numbers<[1], [0], [0], [1], [0, 0, 1, 1], [], []>} : vector<128x128xf32>, vector<128x128xf32>, vector<128x128xf32> -> vector<128x128xf32>
      %c0_20 = arith.constant 0 : index
      %c0_21 = arith.constant 0 : index
      %26 = vector.load %arg7[%c0_20, %c0_21] : memref<1x128xf32, #tpu.memory_space<vmem>>, vector<1x128xf32>
      %27 = vector.broadcast %26 : vector<1x128xf32> to vector<128x128xf32>
      %28 = arith.addf %25, %27 : vector<128x128xf32>
      %cst_22 = arith.constant 0.000000e+00 : f32
      %29 = vector.broadcast %cst_22 : f32 to vector<128x128xf32>
      %30 = arith.maximumf %28, %29 : vector<128x128xf32>
      %31 = arith.truncf %30 : vector<128x128xf32> to vector<128x128xbf16>
      %c0_23 = arith.constant 0 : index
      %c0_24 = arith.constant 0 : index
      %32 = vector.load %arg8[%c0_23, %c0_24] : memref<128x128xbf16, #tpu.memory_space<vmem>>, vector<128x128xbf16>
      tpu.vector_store %arg8[%c0_23, %c0_24], %31 {strides = array<i32>} : memref<128x128xbf16, #tpu.memory_space<vmem>>, vector<128x128xbf16>,
    } else {
    }
    return
  }
  func.func @transform_0(%arg0: i32, %arg1: i32) -> (i32, i32) {
    %c0_i32 = arith.constant 0 : i32
    return %arg0, %arg1 : i32, i32
  }
  func.func @transform_1(%arg0: i32, %arg1: i32) -> (i32, i32) {
    %c0_i32 = arith.constant 0 : i32
    %c0_i32_0 = arith.constant 0 : i32
    %c0_i32_1 = arith.constant 0 : i32
    return %c0_i32, %c0_i32_0 : i32, i32
  }
  func.func @transform_2(%arg0: i32, %arg1: i32) -> (i32, i32) {
    %c0_i32 = arith.constant 0 : i32
    %c0_i32_0 = arith.constant 0 : i32
    %c0_i32_1 = arith.constant 0 : i32
    return %c0_i32, %c0_i32_0 : i32, i32
  }
  func.func @transform_3(%arg0: i32, %arg1: i32) -> (i32, i32) {
    %c0_i32 = arith.constant 0 : i32
    %c0_i32_0 = arith.constant 0 : i32
    %c0_i32_1 = arith.constant 0 : i32
    return %c0_i32, %c0_i32_0 : i32, i32
  }
  func.func @transform_4(%arg0: i32, %arg1: i32) -> (i32, i32) {
    %c0_i32 = arith.constant 0 : i32
    %c0_i32_0 = arith.constant 0 : i32
    %c0_i32_1 = arith.constant 0 : i32
    return %c0_i32, %c0_i32_0 : i32, i32
  }
  func.func @transform_5(%arg0: i32, %arg1: i32) -> (i32, i32) {
    %c0_i32 = arith.constant 0 : i32
    %c0_i32_0 = arith.constant 0 : i32
    %c0_i32_1 = arith.constant 0 : i32
    return %c0_i32, %c0_i32_0 : i32, i32
  }
  func.func @transform_6(%arg0: i32, %arg1: i32) -> (i32, i32) {
    %c0_i32 = arith.constant 0 : i32
    %c0_i32_0 = arith.constant 0 : i32
    return %arg0, %c0_i32 : i32, i32
  }
}

</mosaic_0001>

<bundles_post_ra>
// kernel: tpu_custom_call.1
= control target key start
LH: loop header
LB: loop body
LE: loop exit
PB: predicated region body
PF: predicated region fallthrough
CT: control target
= control target key end

     0   :  { %11 = vsyncpa [#allocation4], 0  ;;  %s930_s0 = inlined_call_operand.hbm [shape: s8[128,128], index: 0, kind: input, shape index: {}]   ;;  %s931_s1 = inlined_call_operand.hbm [shape: bf16[128,128], index: 1, kind: input, shape index: {}]   ;;  %s932_s2 = inlined_call_operand.hbm [shape: f32[128,128], index: 2, kind: input, shape index: {}]   ;;  %s933_s3 = inlined_call_operand.vmem [shape: f32[1,128], index: 3, kind: input, shape index: {}]   ;;  %s934_s4 = inlined_call_operand.hbm [shape: f32[128,128], index: 4, kind: input, shape index: {}]   ;;  %s935_s5 = inlined_call_operand.vmem [shape: f32[1,128], index: 5, kind: input, shape index: {}]   ;;  %s936_s6 = inlined_call_operand.hbm [shape: bf16[128,128], index: 6, kind: output, shape index: {}]  }
   0x1   :  { %12 = vsyncpa [#allocation7], 0 }
   0x2   :  { %13 = vsyncpa [#allocation10], 0  ;;  %s32_s23 = sshll.u32 %s931_s1, 4  ;;  %s33_s23 = int_to_ptr.hbm [resolvable:$true] %s32_s23 }
   0x3   :  { %14 = vsyncpa [#allocation5], 0  ;;  %s859_s24 = smov [#allocation6]   ;;  %s19_s28 = sshll.u32 %s930_s0, 4  ;;  %s20_s28 = int_to_ptr.hbm [resolvable:$true] %s19_s28 }
   0x4   :  { %s34_s25 = sshll.u32 %s859_s24, 4  ;;  %s860_s29 = smov 64   ;;  %s35_s25 = int_to_ptr.vmem [resolvable:$true] %s34_s25 }
   0x5   :  { %s861_s30 = smov 4   ;;  %s862_s7 = smov [#allocation3]  }
   0x6   :  { %40 = dma.hbm_to_vmem [thread:$0]  %s33_s23, 1024, %s35_s25, [#allocation7], %s860_s29, %s860_s29, %s861_s30  }
   0x7   :  { %s21_s8 = sshll.u32 %s862_s7, 4  ;;  %s863_s1 = smov 128   ;;  %s22_s8 = int_to_ptr.vmem [resolvable:$true] %s21_s8 }
   0x8   :  { %s864_s9 = smov 8   ;;  %s45_s12 = sshll.u32 %s932_s2, 4  ;;  %s46_s12 = int_to_ptr.hbm [resolvable:$true] %s45_s12 }
   0x9   :  { %27 = dma.hbm_to_vmem [thread:$0]  %s20_s28, 512, %s22_s8, [#allocation4], %s863_s1, %s863_s1, %s864_s9  }
   0xa   :  { %s865_s13 = smov [#allocation8]   ;;  %s60_s16 = sshll.u32 %s934_s4, 4  ;;  %s61_s16 = int_to_ptr.hbm [resolvable:$true] %s60_s16 }
   0xb   :  { %s47_s0 = sshll.u32 %s865_s13, 4  ;;  %s866_s17 = smov [#allocation9]   ;;  %s48_s0 = int_to_ptr.vmem [resolvable:$true] %s47_s0 }
   0xc   :  { %53 = dma.hbm_to_vmem [thread:$0]  %s46_s12, 2048, %s48_s0, [#allocation7], %s863_s1, %s863_s1, %s864_s9  }
   0xd   :  { %s62_s18 = sshll.u32 %s866_s17, 4  ;;  %s63_s18 = int_to_ptr.vmem [resolvable:$true] %s62_s18 }
   0xe   :  { %68 = dma.hbm_to_vmem [thread:$0]  %s61_s16, 2048, %s63_s18, [#allocation10], %s863_s1, %s863_s1, %s864_s9  }
   0xf   :  { %851 = dma.done.wait [#allocation4], 512  }
  0x10   :  { %852 = vsyncadd [#allocation4], 4294966784 }
  0x11   :  { %853 = dma.done.wait [#allocation7], 3072  }
  0x12   :  { %854 = vsyncadd [#allocation7], 4294964224 }
  0x13   :  { %855 = dma.done.wait [#allocation10], 2048  }
  0x14   :  { %856 = vsyncadd [#allocation10], 4294965248  ;;  %v632_v0 = vld [vmem:[#allocation6 + $0x38] sm:$0xff]  ;;  %v631_v1 = vld [vmem:[#allocation6 + $0x30] sm:$0xff]  ;;  %s576_s23 = sshll.u32 %s936_s6, 4  ;;  %s577_s23 = int_to_ptr.hbm [resolvable:$true] %s576_s23 }
  0x15   :  { %236 = vmatpush.bf16.msra.mxu0 %v632_v0  ;;  %680 = vmatpush.bf16.msra.mxu3 %v632_v0  ;;  %v630_v2 = vld [vmem:[#allocation6 + $0x28] sm:$0xff]  ;;  %v629_v3 = vld [vmem:[#allocation6 + $0x20] sm:$0xff]  ;;  %v628_v4 = vld [vmem:[#allocation6 + $0x18] sm:$0xff] }
  0x16   :  { %v627_v5 = vld [vmem:[#allocation6 + $0x10] sm:$0xff]  ;;  %v144_v6 = vld [vmem:[#allocation3] sm:$0xff]  ;;  %v626_v9 = vld [vmem:[#allocation6 + $0x8] sm:$0xff] }
  0x17   :  { %v148_v7 = vunpack.c.0.s8 %v144_v6  ;;  %v149_v8 = vunpack.c.1.s8 %v144_v6  ;;  %v625_v12 = vld [vmem:[#allocation6] sm:$0xff]  ;;  %v147_v14 = vld [vmem:[#allocation3 + $0x18] sm:$0xff]  ;;  %v150_v19 = vunpack.c.2.s8 %v144_v6  ;;  %v151_v20 = vunpack.c.3.s8 %v144_v6  ;;  %v145_v27 = vld [vmem:[#allocation3 + $0x8] sm:$0xff] }
  0x18   :  { %v160_v15 = vunpack.c.0.s8 %v147_v14  ;;  %v161_v16 = vunpack.c.1.s8 %v147_v14  ;;  %v162_v25 = vunpack.c.2.s8 %v147_v14  ;;  %v163_v26 = vunpack.c.3.s8 %v147_v14  ;;  %v351_v41 = vld [vmem:[#allocation8 + $0x78] sm:$0xff]  ;;  %v350_v42 = vld [vmem:[#allocation8 + $0x70] sm:$0xff]  ;;  %v349_v44 = vld [vmem:[#allocation8 + $0x68] sm:$0xff] }
  0x19   :  { %237 = vmatpush.bf16.msra.mxu0 %v631_v1  ;;  %681 = vmatpush.bf16.msra.mxu3 %v631_v1  ;;  %v164_v10 = vcvt.s32.f32 %v148_v7  ;;  %v165_v11 = vcvt.s32.f32 %v149_v8  ;;  %v166_v22 = vcvt.s32.f32 %v150_v19  ;;  %v167_v23 = vcvt.s32.f32 %v151_v20  ;;  %v146_v43 = vld [vmem:[#allocation3 + $0x10] sm:$0xff]  ;;  %v348_v47 = vld [vmem:[#allocation8 + $0x60] sm:$0xff]  ;;  %v347_v48 = vld [vmem:[#allocation8 + $0x58] sm:$0xff] }
  0x1a   :  { %v176_v17 = vcvt.s32.f32 %v160_v15  ;;  %v177_v18 = vcvt.s32.f32 %v161_v16  ;;  %v178_v28 = vcvt.s32.f32 %v162_v25  ;;  %v179_v29 = vcvt.s32.f32 %v163_v26  ;;  %356 = vmatpush.msra.mxu1 %v351_v41  ;;  %v346_v51 = vld [vmem:[#allocation8 + $0x50] sm:$0xff]  ;;  %v345_v52 = vld [vmem:[#allocation8 + $0x48] sm:$0xff]  ;;  %v344_v54 = vld [vmem:[#allocation8 + $0x40] sm:$0xff] }
  0x1b   :  { %v180_v13 = vpack.c.bf16 %v165_v11, %v164_v10  ;;  %v181_v24 = vpack.c.bf16 %v167_v23, %v166_v22  ;;  %v152_v30 = vunpack.c.0.s8 %v145_v27  ;;  %v153_v31 = vunpack.c.1.s8 %v145_v27  ;;  %v343_v55 = vld [vmem:[#allocation8 + $0x38] sm:$0xff]  ;;  %v342_v56 = vld [vmem:[#allocation8 + $0x30] sm:$0xff]  ;;  %v341_v57 = vld [vmem:[#allocation8 + $0x28] sm:$0xff] }
  0x1c   :  { %v186_v21 = vpack.c.bf16 %v177_v18, %v176_v17  ;;  %v187_v32 = vpack.c.bf16 %v179_v29, %v178_v28  ;;  %v154_v36 = vunpack.c.2.s8 %v145_v27  ;;  %v155_v37 = vunpack.c.3.s8 %v145_v27  ;;  %357 = vmatpush.msra.mxu1 %v350_v42  ;;  %v340_v60 = vld [vmem:[#allocation8 + $0x20] sm:$0xff]  ;;  %v339_v61 = vld [vmem:[#allocation8 + $0x18] sm:$0xff]  ;;  %v338_v0 = vld [vmem:[#allocation8 + $0x10] sm:$0xff] }
  0x1d   :  { %238 = vmatpush.bf16.msra.mxu0 %v630_v2  ;;  %682 = vmatpush.bf16.msra.mxu3 %v630_v2  ;;  %v168_v33 = vcvt.s32.f32 %v152_v30  ;;  %v169_v34 = vcvt.s32.f32 %v153_v31  ;;  %v156_v45 = vunpack.c.0.s8 %v146_v43  ;;  %v157_v46 = vunpack.c.1.s8 %v146_v43  ;;  %v337_v1 = vld [vmem:[#allocation8 + $0x8] sm:$0xff]  ;;  %v452_v16 = vld [vmem:[#allocation9 + $0x78] sm:$0xff]  ;;  %v451_v17 = vld [vmem:[#allocation9 + $0x70] sm:$0xff] }
  0x1e   :  { %v170_v38 = vcvt.s32.f32 %v154_v36  ;;  %v171_v39 = vcvt.s32.f32 %v155_v37  ;;  %358 = vmatpush.msra.mxu1 %v349_v44  ;;  %v158_v58 = vunpack.c.2.s8 %v146_v43  ;;  %v159_v59 = vunpack.c.3.s8 %v146_v43  ;;  %457 = vmatpush.msra.mxu2 %v452_v16  ;;  %v450_v18 = vld [vmem:[#allocation9 + $0x68] sm:$0xff]  ;;  %v449_v19 = vld [vmem:[#allocation9 + $0x60] sm:$0xff]  ;;  %v448_v20 = vld [vmem:[#allocation9 + $0x58] sm:$0xff] }
  0x1f   :  { %v182_v35 = vpack.c.bf16 %v169_v34, %v168_v33  ;;  %v172_v49 = vcvt.s32.f32 %v156_v45  ;;  %v173_v50 = vcvt.s32.f32 %v157_v46  ;;  %v447_v22 = vld [vmem:[#allocation9 + $0x50] sm:$0xff]  ;;  %v446_v23 = vld [vmem:[#allocation9 + $0x48] sm:$0xff]  ;;  %v444_v25 = vld [vmem:[#allocation9 + $0x38] sm:$0xff] }
  0x20   :  { %v183_v40 = vpack.c.bf16 %v171_v39, %v170_v38  ;;  %359 = vmatpush.msra.mxu1 %v348_v47  ;;  %v174_v62 = vcvt.s32.f32 %v158_v58  ;;  %v175_v63 = vcvt.s32.f32 %v159_v59  ;;  %458 = vmatpush.msra.mxu2 %v451_v17  ;;  %v443_v27 = vld [vmem:[#allocation9 + $0x30] sm:$0xff]  ;;  %v442_v28 = vld [vmem:[#allocation9 + $0x28] sm:$0xff]  ;;  %v441_v29 = vld [vmem:[#allocation9 + $0x20] sm:$0xff] }
  0x21   :  { %239 = vmatpush.bf16.msra.mxu0 %v629_v3  ;;  %683 = vmatpush.bf16.msra.mxu3 %v629_v3  ;;  %v184_v53 = vpack.c.bf16 %v173_v50, %v172_v49  ;;  %v336_v3 = vld [vmem:[#allocation8] sm:$0xff]  ;;  %v440_v30 = vld [vmem:[#allocation9 + $0x18] sm:$0xff]  ;;  %v439_v33 = vld [vmem:[#allocation9 + $0x10] sm:$0xff] }
  0x22   :  { %360 = vmatpush.msra.mxu1 %v347_v48  ;;  %v185_v2 = vpack.c.bf16 %v175_v63, %v174_v62  ;;  %459 = vmatpush.msra.mxu2 %v450_v18  ;;  %v438_v34 = vld [vmem:[#allocation9 + $0x8] sm:$0xff]  ;;  %v729_v36 = vld [vmem:[%s933_s3] ss:$0 sm:$0xff] }
  0x24   :  { %361 = vmatpush.msra.mxu1 %v346_v51  ;;  %460 = vmatpush.msra.mxu2 %v449_v19 }
  0x25   :  { %240 = vmatpush.bf16.msra.mxu0 %v628_v4  ;;  %684 = vmatpush.bf16.msra.mxu3 %v628_v4 }
  0x26   :  { %362 = vmatpush.msra.mxu1 %v345_v52  ;;  %461 = vmatpush.msra.mxu2 %v448_v20 }
  0x28   :  { %363 = vmatpush.msra.mxu1 %v344_v54  ;;  %462 = vmatpush.msra.mxu2 %v447_v22 }
  0x29   :  { %241 = vmatpush.bf16.msra.mxu0 %v627_v5  ;;  %685 = vmatpush.bf16.msra.mxu3 %v627_v5 }
  0x2a   :  { %364 = vmatpush.msra.mxu1 %v343_v55  ;;  %463 = vmatpush.msra.mxu2 %v446_v23 }
  0x2c   :  { %365 = vmatpush.msra.mxu1 %v342_v56 }
  0x2d   :  { %242 = vmatpush.bf16.msra.mxu0 %v626_v9  ;;  %686 = vmatpush.bf16.msra.mxu3 %v626_v9 }
  0x2e   :  { %366 = vmatpush.msra.mxu1 %v341_v57 }
  0x30   :  { %367 = vmatpush.msra.mxu1 %v340_v60 }
  0x31   :  { %243 = vmatpush.bf16.msra.mxu0 %v625_v12  ;;  %687 = vmatpush.bf16.msra.mxu3 %v625_v12 }
  0x32   :  { %368 = vmatpush.msra.mxu1 %v339_v61 }
  0x34   :  { %244 = vmatmul.bf16.vlgmr.msra.gmra.mxu0 %v180_v13  ;;  %274 = vmatmul.bf16.vlgmr.msra.gmra.mxu3 %v186_v21 }
  0x35   :  { %688 = vmatpush.msrb.mxu3 %v351_v41  ;;  %369 = vmatpush.msra.mxu1 %v338_v0 }
  0x37   :  { %689 = vmatpush.msrb.mxu3 %v350_v42  ;;  %370 = vmatpush.msra.mxu1 %v337_v1 }
  0x39   :  { %690 = vmatpush.msrb.mxu3 %v349_v44  ;;  %371 = vmatpush.msra.mxu1 %v336_v3 }
  0x3b   :  { %691 = vmatpush.msrb.mxu3 %v348_v47 }
  0x3d   :  { %692 = vmatpush.msrb.mxu3 %v347_v48 }
  0x3f   :  { %693 = vmatpush.msrb.mxu3 %v346_v51 }
  0x41   :  { %694 = vmatpush.msrb.mxu3 %v345_v52 }
  0x43   :  { %695 = vmatpush.msrb.mxu3 %v344_v54 }
  0x44   :  { %249 = vmatmul.bf16.gmra.mxu0 %v181_v24  ;;  %279 = vmatmul.bf16.gmra.mxu3 %v187_v32  ;;  %v445_v24 = vld [vmem:[#allocation9 + $0x40] sm:$0xff] }
  0x45   :  { %696 = vmatpush.msrb.mxu3 %v343_v55  ;;  %464 = vmatpush.msra.mxu2 %v445_v24 }
  0x47   :  { %697 = vmatpush.msrb.mxu3 %v342_v56  ;;  %465 = vmatpush.msra.mxu2 %v444_v25 }
  0x49   :  { %698 = vmatpush.msrb.mxu3 %v341_v57  ;;  %466 = vmatpush.msra.mxu2 %v443_v27 }
  0x4b   :  { %699 = vmatpush.msrb.mxu3 %v340_v60  ;;  %467 = vmatpush.msra.mxu2 %v442_v28 }
  0x4d   :  { %700 = vmatpush.msrb.mxu3 %v339_v61  ;;  %468 = vmatpush.msra.mxu2 %v441_v29 }
  0x4f   :  { %701 = vmatpush.msrb.mxu3 %v338_v0  ;;  %469 = vmatpush.msra.mxu2 %v440_v30 }
  0x51   :  { %702 = vmatpush.msrb.mxu3 %v337_v1  ;;  %470 = vmatpush.msra.mxu2 %v439_v33 }
  0x53   :  { %703 = vmatpush.msrb.mxu3 %v336_v3  ;;  %471 = vmatpush.msra.mxu2 %v438_v34 }
  0x54   :  { %254 = vmatmul.bf16.gmra.mxu0 %v182_v35  ;;  %v437_v35 = vld [vmem:[#allocation9] sm:$0xff] }
  0x55   :  { %704 = vmatpush.msra.mxu3 %v452_v16  ;;  %472 = vmatpush.msra.mxu2 %v437_v35 }
  0x57   :  { %705 = vmatpush.msra.mxu3 %v451_v17 }
  0x59   :  { %706 = vmatpush.msra.mxu3 %v450_v18 }
  0x5b   :  { %707 = vmatpush.msra.mxu3 %v449_v19 }
  0x5d   :  { %708 = vmatpush.msra.mxu3 %v448_v20 }
  0x5f   :  { %709 = vmatpush.msra.mxu3 %v447_v22  ;;  %v730_v22 = vld [vmem:[%s935_s5] ss:$0 sm:$0xff]  ;;  %s867_s5 = smov [#allocation11]  }
  0x60   :  { %s574_s20 = sshll.u32 %s867_s5, 4  ;;  %s575_s20 = int_to_ptr.vmem [resolvable:$true] %s574_s20 }
  0x61   :  { %710 = vmatpush.msra.mxu3 %v446_v23 }
  0x63   :  { %711 = vmatpush.msra.mxu3 %v445_v24 }
  0x64   :  { %259 = vmatmul.bf16.gmra.mxu0 %v183_v40 }
  0x65   :  { %712 = vmatpush.msra.mxu3 %v444_v25 }
  0x67   :  { %713 = vmatpush.msra.mxu3 %v443_v27 }
  0x69   :  { %714 = vmatpush.msra.mxu3 %v442_v28 }
  0x6b   :  { %715 = vmatpush.msra.mxu3 %v441_v29 }
  0x6d   :  { %716 = vmatpush.msra.mxu3 %v440_v30 }
  0x6f   :  { %717 = vmatpush.msra.mxu3 %v439_v33 }
  0x71   :  { %718 = vmatpush.msra.mxu3 %v438_v34 }
  0x73   :  { %719 = vmatpush.msra.mxu3 %v437_v35 }
  0x74   :  { %264 = vmatmul.bf16.gmra.mxu0 %v184_v53 }
  0x84   :  { %269 = vmatmul.bf16.gmra.mxu0 %v185_v2 }
  0xb1   :  { %v245_v4 = vpop.f32.mrf.mxu0 }
  0xb2   :  { %372 = vmatmul.f32.vlgmr.msra.gmra.mxu1 %v245_v4 }
  0xb7   :  { %v275_v7 = vpop.f32.mrf.mxu3 }
  0xb8   :  { %408 = vmatmul.f32.vlgmr.msrb.gmra.mxu3 %v275_v7 }
  0xb9   :  { %v247_v5 = vpop.f32.mrf.mxu0 }
  0xba   :  { %375 = vmatmul.f32.gmra.mxu1 %v247_v5 }
  0xbf   :  { %v277_v9 = vpop.f32.mrf.mxu3 }
  0xc0   :  { %411 = vmatmul.f32.gmra.mxu3 %v277_v9 }
  0xc1   :  { %v250_v6 = vpop.f32.mrf.mxu0 }
  0xc2   :  { %378 = vmatmul.f32.gmra.mxu1 %v250_v6 }
  0xc7   :  { %v280_v11 = vpop.f32.mrf.mxu3 }
  0xc8   :  { %414 = vmatmul.f32.gmra.mxu3 %v280_v11 }
  0xc9   :  { %v252_v8 = vpop.f32.mrf.mxu0 }
  0xca   :  { %381 = vmatmul.f32.gmra.mxu1 %v252_v8 }
  0xcf   :  { %v282_v13 = vpop.f32.mrf.mxu3 }
  0xd0   :  { %417 = vmatmul.f32.gmra.mxu3 %v282_v13 }
  0xd1   :  { %v255_v10 = vpop.f32.mrf.mxu0 }
  0xd2   :  { %384 = vmatmul.f32.gmra.mxu1 %v255_v10 }
  0xd9   :  { %v257_v12 = vpop.f32.mrf.mxu0 }
  0xda   :  { %387 = vmatmul.f32.gmra.mxu1 %v257_v12 }
  0xe1   :  { %v260_v14 = vpop.f32.mrf.mxu0 }
  0xe2   :  { %390 = vmatmul.f32.gmra.mxu1 %v260_v14 }
  0xe9   :  { %v262_v15 = vpop.f32.mrf.mxu0 }
  0xea   :  { %393 = vmatmul.f32.gmra.mxu1 %v262_v15 }
  0xf1   :  { %v265_v21 = vpop.f32.mrf.mxu0 }
  0xf2   :  { %396 = vmatmul.f32.gmra.mxu1 %v265_v21 }
  0xf9   :  { %v267_v26 = vpop.f32.mrf.mxu0 }
  0xfa   :  { %399 = vmatmul.f32.gmra.mxu1 %v267_v26 }
 0x101   :  { %v270_v31 = vpop.f32.mrf.mxu0 }
 0x102   :  { %402 = vmatmul.f32.gmra.mxu1 %v270_v31 }
 0x109   :  { %v272_v32 = vpop.f32.mrf.mxu0 }
 0x10a   :  { %405 = vmatmul.f32.gmra.mxu1 %v272_v32 }
 0x12f   :  { %v373_v37 = vpop.f32.mrf.mxu1 }
 0x130   :  { %v374_v38 = vadd.f32 %v729_v36, %v373_v37 }
 0x132   :  { %v421_v39 = vmax.f32 %v374_v38, 0.0 }
 0x134   :  { %473 = vmatmul.f32.vlgmr.msra.gmra.mxu2 %v421_v39 }
 0x137   :  { %v376_v40 = vpop.f32.mrf.mxu1 }
 0x138   :  { %v377_v41 = vadd.f32 %v729_v36, %v376_v40 }
 0x13a   :  { %v422_v42 = vmax.f32 %v377_v41, 0.0 }
 0x13b   :  { %v409_v47 = vpop.f32.mrf.mxu3 }
 0x13c   :  { %476 = vmatmul.f32.gmra.mxu2 %v422_v42  ;;  %v410_v49 = vadd.f32 %v729_v36, %v409_v47 }
 0x13e   :  { %v433_v51 = vmax.f32 %v410_v49, 0.0 }
 0x13f   :  { %v379_v43 = vpop.f32.mrf.mxu1 }
 0x140   :  { %v380_v44 = vadd.f32 %v729_v36, %v379_v43  ;;  %509 = vmatmul.f32.vlgmr.msra.gmra.mxu3 %v433_v51 }
 0x142   :  { %v423_v45 = vmax.f32 %v380_v44, 0.0 }
 0x143   :  { %v412_v53 = vpop.f32.mrf.mxu3 }
 0x144   :  { %479 = vmatmul.f32.gmra.mxu2 %v423_v45  ;;  %v413_v55 = vadd.f32 %v729_v36, %v412_v53 }
 0x146   :  { %v434_v57 = vmax.f32 %v413_v55, 0.0 }
 0x147   :  { %v382_v46 = vpop.f32.mrf.mxu1 }
 0x148   :  { %v383_v48 = vadd.f32 %v729_v36, %v382_v46  ;;  %512 = vmatmul.f32.gmra.mxu3 %v434_v57 }
 0x14a   :  { %v424_v50 = vmax.f32 %v383_v48, 0.0 }
 0x14b   :  { %v415_v59 = vpop.f32.mrf.mxu3 }
 0x14c   :  { %482 = vmatmul.f32.gmra.mxu2 %v424_v50  ;;  %v416_v61 = vadd.f32 %v729_v36, %v415_v59 }
 0x14e   :  { %v435_v63 = vmax.f32 %v416_v61, 0.0 }
 0x14f   :  { %v385_v52 = vpop.f32.mrf.mxu1 }
 0x150   :  { %v386_v54 = vadd.f32 %v729_v36, %v385_v52  ;;  %515 = vmatmul.f32.gmra.mxu3 %v435_v63 }
 0x152   :  { %v425_v56 = vmax.f32 %v386_v54, 0.0 }
 0x153   :  { %v418_v1 = vpop.f32.mrf.mxu3 }
 0x154   :  { %485 = vmatmul.f32.gmra.mxu2 %v425_v56  ;;  %v419_v3 = vadd.f32 %v729_v36, %v418_v1 }
 0x156   :  { %v436_v5 = vmax.f32 %v419_v3, 0.0 }
 0x157   :  { %v388_v58 = vpop.f32.mrf.mxu1 }
 0x158   :  { %v389_v60 = vadd.f32 %v729_v36, %v388_v58  ;;  %518 = vmatmul.f32.gmra.mxu3 %v436_v5 }
 0x15a   :  { %v426_v62 = vmax.f32 %v389_v60, 0.0 }
 0x15c   :  { %488 = vmatmul.f32.gmra.mxu2 %v426_v62 }
 0x15f   :  { %v391_v0 = vpop.f32.mrf.mxu1 }
 0x160   :  { %v392_v2 = vadd.f32 %v729_v36, %v391_v0 }
 0x162   :  { %v427_v4 = vmax.f32 %v392_v2, 0.0 }
 0x164   :  { %491 = vmatmul.f32.gmra.mxu2 %v427_v4 }
 0x167   :  { %v394_v6 = vpop.f32.mrf.mxu1 }
 0x168   :  { %v395_v7 = vadd.f32 %v729_v36, %v394_v6 }
 0x16a   :  { %v428_v8 = vmax.f32 %v395_v7, 0.0 }
 0x16c   :  { %494 = vmatmul.f32.gmra.mxu2 %v428_v8 }
 0x16f   :  { %v397_v9 = vpop.f32.mrf.mxu1 }
 0x170   :  { %v398_v10 = vadd.f32 %v729_v36, %v397_v9 }
 0x172   :  { %v429_v11 = vmax.f32 %v398_v10, 0.0 }
 0x174   :  { %497 = vmatmul.f32.gmra.mxu2 %v429_v11 }
 0x177   :  { %v400_v12 = vpop.f32.mrf.mxu1 }
 0x178   :  { %v401_v13 = vadd.f32 %v729_v36, %v400_v12 }
 0x17a   :  { %v430_v14 = vmax.f32 %v401_v13, 0.0 }
 0x17c   :  { %500 = vmatmul.f32.gmra.mxu2 %v430_v14 }
 0x17f   :  { %v403_v15 = vpop.f32.mrf.mxu1 }
 0x180   :  { %v404_v16 = vadd.f32 %v729_v36, %v403_v15 }
 0x182   :  { %v431_v17 = vmax.f32 %v404_v16, 0.0 }
 0x184   :  { %503 = vmatmul.f32.gmra.mxu2 %v431_v17 }
 0x187   :  { %v406_v18 = vpop.f32.mrf.mxu1 }
 0x188   :  { %v407_v19 = vadd.f32 %v729_v36, %v406_v18 }
 0x18a   :  { %v432_v20 = vmax.f32 %v407_v19, 0.0 }
 0x18c   :  { %506 = vmatmul.f32.gmra.mxu2 %v432_v20 }
 0x1b7   :  { %v474_v21 = vpop.f32.mrf.mxu2 }
 0x1b8   :  { %v475_v23 = vadd.f32 %v730_v22, %v474_v21 }
 0x1ba   :  { %v522_v26 = vmax.f32 %v475_v23, 0.0 }
 0x1bf   :  { %v477_v24 = vpop.f32.mrf.mxu2 }
 0x1c0   :  { %v478_v25 = vadd.f32 %v730_v22, %v477_v24 }
 0x1c2   :  { %v523_v27 = vmax.f32 %v478_v25, 0.0 }
 0x1c3   :  { %v510_v32 = vpop.f32.mrf.mxu3 }
 0x1c4   :  { %v636_v28 = vpack.c.bf16 %v523_v27, %v522_v26  ;;  %v511_v37 = vadd.f32 %v730_v22, %v510_v32 }
 0x1c6   :  { %637 = vst [vmem:[#allocation11] sm:$0xff] %v636_v28   ;;  %v534_v40 = vmax.f32 %v511_v37, 0.0 }
 0x1c7   :  { %v480_v29 = vpop.f32.mrf.mxu2 }
 0x1c8   :  { %v481_v30 = vadd.f32 %v730_v22, %v480_v29 }
 0x1ca   :  { %v524_v34 = vmax.f32 %v481_v30, 0.0 }
 0x1cb   :  { %v513_v39 = vpop.f32.mrf.mxu3 }
 0x1cc   :  { %v514_v41 = vadd.f32 %v730_v22, %v513_v39 }
 0x1ce   :  { %v535_v42 = vmax.f32 %v514_v41, 0.0 }
 0x1cf   :  { %v483_v31 = vpop.f32.mrf.mxu2 }
 0x1d0   :  { %v484_v33 = vadd.f32 %v730_v22, %v483_v31  ;;  %v666_v43 = vpack.c.bf16 %v535_v42, %v534_v40 }
 0x1d2   :  { %v525_v35 = vmax.f32 %v484_v33, 0.0  ;;  %678 = vst [vmem:[#allocation11 + $0x30] sm:$0xff] %v666_v43  }
 0x1d3   :  { %v516_v46 = vpop.f32.mrf.mxu3 }
 0x1d4   :  { %v641_v36 = vpack.c.bf16 %v525_v35, %v524_v34  ;;  %v517_v51 = vadd.f32 %v730_v22, %v516_v46 }
 0x1d6   :  { %673 = vst [vmem:[#allocation11 + $0x8] sm:$0xff] %v641_v36   ;;  %v536_v54 = vmax.f32 %v517_v51, 0.0 }
 0x1d7   :  { %v486_v38 = vpop.f32.mrf.mxu2 }
 0x1d8   :  { %v487_v44 = vadd.f32 %v730_v22, %v486_v38 }
 0x1da   :  { %v526_v48 = vmax.f32 %v487_v44, 0.0 }
 0x1db   :  { %v519_v53 = vpop.f32.mrf.mxu3 }
 0x1dc   :  { %v520_v55 = vadd.f32 %v730_v22, %v519_v53 }
 0x1de   :  { %v537_v56 = vmax.f32 %v520_v55, 0.0 }
 0x1df   :  { %v489_v45 = vpop.f32.mrf.mxu2 }
 0x1e0   :  { %v490_v47 = vadd.f32 %v730_v22, %v489_v45  ;;  %v671_v57 = vpack.c.bf16 %v537_v56, %v536_v54 }
 0x1e2   :  { %v527_v49 = vmax.f32 %v490_v47, 0.0  ;;  %679 = vst [vmem:[#allocation11 + $0x38] sm:$0xff] %v671_v57  }
 0x1e4   :  { %v646_v50 = vpack.c.bf16 %v527_v49, %v526_v48 }
 0x1e6   :  { %674 = vst [vmem:[#allocation11 + $0x10] sm:$0xff] %v646_v50  }
 0x1e7   :  { %v492_v52 = vpop.f32.mrf.mxu2 }
 0x1e8   :  { %v493_v58 = vadd.f32 %v730_v22, %v492_v52 }
 0x1ea   :  { %v528_v61 = vmax.f32 %v493_v58, 0.0 }
 0x1ef   :  { %v495_v59 = vpop.f32.mrf.mxu2 }
 0x1f0   :  { %v496_v60 = vadd.f32 %v730_v22, %v495_v59 }
 0x1f2   :  { %v529_v62 = vmax.f32 %v496_v60, 0.0 }
 0x1f4   :  { %v651_v63 = vpack.c.bf16 %v529_v62, %v528_v61 }
 0x1f6   :  { %675 = vst [vmem:[#allocation11 + $0x18] sm:$0xff] %v651_v63  }
 0x1f7   :  { %v498_v0 = vpop.f32.mrf.mxu2 }
 0x1f8   :  { %v499_v1 = vadd.f32 %v730_v22, %v498_v0 }
 0x1fa   :  { %v530_v4 = vmax.f32 %v499_v1, 0.0 }
 0x1ff   :  { %v501_v2 = vpop.f32.mrf.mxu2 }
 0x200   :  { %v502_v3 = vadd.f32 %v730_v22, %v501_v2 }
 0x202   :  { %v531_v5 = vmax.f32 %v502_v3, 0.0 }
 0x204   :  { %v656_v6 = vpack.c.bf16 %v531_v5, %v530_v4 }
 0x206   :  { %676 = vst [vmem:[#allocation11 + $0x20] sm:$0xff] %v656_v6  }
 0x207   :  { %v504_v7 = vpop.f32.mrf.mxu2 }
 0x208   :  { %v505_v8 = vadd.f32 %v730_v22, %v504_v7 }
 0x20a   :  { %v532_v11 = vmax.f32 %v505_v8, 0.0 }
 0x20f   :  { %v507_v9 = vpop.f32.mrf.mxu2 }
 0x210   :  { %v508_v10 = vadd.f32 %v730_v22, %v507_v9 }
 0x212   :  { %v533_v12 = vmax.f32 %v508_v10, 0.0 }
 0x214   :  { %v661_v13 = vpack.c.bf16 %v533_v12, %v532_v11 }
 0x216   :  { %677 = vst [vmem:[#allocation11 + $0x28] sm:$0xff] %v661_v13  }
 0x217   :  { %582 = dma.vmem_to_hbm [thread:$0]  %s575_s20, 1024, %s577_s23, [#allocation5], %s860_s29, %s860_s29, %s861_s30  }
 0x218   :  { %857 = dma.done.wait [#allocation5], 1024  }
 0x219   :  { %858 = vsyncadd [#allocation5], 4294966272 }
 0x21a   :  { %587 = vsyncpa [#allocation4], 1 }
 0x21b   :  { %588 = vsyncpa [#allocation7], 1 }
 0x21c   :  { %589 = vsyncpa [#allocation10], 1 }
 0x21d   :  { %590 = vsyncpa [#allocation5], 1 }

</bundles_post_ra>
